<compile_context>
chip_gen: v7x
topology: tpu7x:2x2x1
jax: 0.10.0
libtpu: 0.0.40
codegen_flags: <defaults>
</compile_context>

<pallas_src>
import jax
import jax.numpy as jnp
from jax.experimental import pallas as pl
from jax.experimental.pallas import tpu as pltpu


def attention_kernel(enc_ref, att2_ref, wet_ref, wf_ref, awe_ref, alpha_ref):
    # enc_ref  : (bb, P, F)  encoder features (bf16 / MXU dtype)
    # att2_ref : (bb, 1, A)  precomputed dec @ Wd^T + bd + be  (f32)
    # wet_ref  : (F, A)      pre-transposed encoder_att weight (MXU dtype)
    # wf_ref   : (1, A)      full_att weight (f32)
    # awe_ref  : (bb, F)     attention-weighted encoding (full-slab store)
    # alpha_ref: (bb, P)     attention weights (lane-dense, full-slab store)
    bb, P, F = enc_ref.shape
    A = wet_ref.shape[1]

    enc = enc_ref[...]                                            # (bb, P, F)

    # --- encoder_att: ONE batched MXU matmul over the whole block -----------
    att1 = jnp.dot(enc.reshape(bb * P, F), wet_ref[...],
                   preferred_element_type=jnp.float32)            # (bb*P, A) f32

    # + hoisted decoder projection (biases folded in), ReLU
    h = jnp.maximum(att1.reshape(bb, P, A) + att2_ref[...], 0.0)  # (bb, P, A) f32

    # --- full_att scores: VPU multiply + lane reduce over A -> (bb, P) ------
    # (full_att bias dropped: softmax is shift-invariant)
    wf = wf_ref[...].astype(jnp.float32).reshape(1, 1, A)
    scores = jnp.sum(h * wf, axis=-1)                             # (bb, P) f32

    # --- softmax over pixels, batched across the block (lane reduce) --------
    m = jnp.max(scores, axis=-1, keepdims=True)                   # (bb, 1)
    e = jnp.exp(scores - m)
    s = jnp.sum(e, axis=-1, keepdims=True)
    inv = pl.reciprocal(s, approx=True)
    inv = inv * (2.0 - s * inv)                                   # one Newton step
    alpha = e * inv                                               # (bb, P) f32

    alpha_ref[...] = alpha.astype(alpha_ref.dtype)                # unmasked slab store

    # --- context vector on the VPU: broadcast-mult + sublane reduce over P --
    awe = jnp.sum(enc.astype(jnp.float32) * alpha[:, :, None], axis=1)   # (bb, F) f32
    awe_ref[...] = awe.astype(awe_ref.dtype)                      # unmasked slab store


def _vmem_estimate(bb, P, F, A, mxu_itemsize, out_itemsize):
    """Rough per-step VMEM footprint (inputs/outputs double-buffered by default)."""
    return (
        2 * bb * P * F * mxu_itemsize        # encoder block x2 buffers
        + 2 * bb * 1 * A * 4                 # att2 block x2 (f32)
        + 2 * F * A * mxu_itemsize           # We^T (double-buffered by default)
        + 2 * 1 * A * 4                      # W_full
        + 2 * bb * F * out_itemsize          # awe output x2
        + 2 * bb * P * out_itemsize          # alpha output x2
        + 2 * bb * P * A * 4                 # att1 / h f32 intermediates
        + bb * P * F * 4                     # f32 upcast of enc for the context
    )


def _pick_block_b(B, P, F, A, mxu_itemsize, out_itemsize, block_b,
                  budget_bytes=48 << 20):
    if block_b is not None:
        assert B % block_b == 0, "block_b must divide the batch size"
        return block_b
    fitting = []
    for cand in range(1, B + 1):
        if B % cand:
            continue
        # Keep (cand, F) / (cand, P) output slabs unmasked: multiple of 8 or == B.
        if cand % 8 and cand != B:
            continue
        if _vmem_estimate(cand, P, F, A, mxu_itemsize, out_itemsize) <= budget_bytes:
            fitting.append(cand)
    if not fitting:
        valid = [c for c in range(1, B + 1) if B % c == 0 and (c % 8 == 0 or c == B)]
        return min(valid)
    # Prefer the largest candidate that still leaves >= 2 grid steps so the
    # "parallel" batch axis can split across v7x's two TensorCores.
    multi = [c for c in fitting if B // c >= 2]
    return max(multi) if multi else max(fitting)


def attention_forward(encoder_out, decoder_hidden, params, *,
                      block_b=None, mxu_dtype=jnp.bfloat16,
                      vmem_limit_bytes=None):
    B, P, F = encoder_out.shape
    A = params["we"].shape[0]
    out_dtype = encoder_out.dtype

    # Hoisted decoder projection: one batched (B,H)@(H,A) XLA matmul with both
    # additive biases folded in. The full_att bias is dropped (softmax invariance).
    att2 = (decoder_hidden.astype(jnp.float32)
            @ params["wd"].T.astype(jnp.float32)
            + params["bd"].astype(jnp.float32).reshape(1, A)
            + params["be"].astype(jnp.float32).reshape(1, A)).reshape(B, 1, A)

    enc = encoder_out.astype(mxu_dtype)           # bf16 MXU operands
    we_t = params["we"].T.astype(mxu_dtype)       # (F, A): transpose once, outside
    wf = params["wf"].astype(jnp.float32).reshape(1, A)

    mxu_itemsize = jnp.dtype(mxu_dtype).itemsize
    out_itemsize = jnp.dtype(out_dtype).itemsize
    bb = _pick_block_b(B, P, F, A, mxu_itemsize, out_itemsize, block_b)
    nb = B // bb

    if vmem_limit_bytes is None:
        est = _vmem_estimate(bb, P, F, A, mxu_itemsize, out_itemsize)
        # Raise v5e's 16 MiB scoped default when needed; stay under v7x's 64 MiB.
        vmem_limit_bytes = int(min(max(2 * est, 32 << 20), 56 << 20))

    awe, alpha = pl.pallas_call(
        attention_kernel,
        out_shape=(
            jax.ShapeDtypeStruct((B, F), out_dtype),
            jax.ShapeDtypeStruct((B, P), out_dtype),
        ),
        grid_spec=pltpu.PrefetchScalarGridSpec(
            num_scalar_prefetch=0,
            grid=(nb,),
            in_specs=[
                pl.BlockSpec((bb, P, F), lambda i: (i, 0, 0)),    # encoder block
                pl.BlockSpec((bb, 1, A), lambda i: (i, 0, 0)),    # precomputed att2
                pl.BlockSpec((F, A), lambda i: (0, 0)),           # We^T (resident)
                pl.BlockSpec((1, A), lambda i: (0, 0)),           # W_full
            ],
            out_specs=[
                pl.BlockSpec((bb, F), lambda i: (i, 0)),          # awe slab
                pl.BlockSpec((bb, P), lambda i: (i, 0)),          # alpha slab
            ],
        ),
        compiler_params=pltpu.CompilerParams(
            dimension_semantics=("parallel",),
            vmem_limit_bytes=vmem_limit_bytes),
    )(enc, att2, we_t, wf)

    return awe, alpha


def attention_reference(encoder_out, decoder_hidden, params):
    """Pure-JAX reference matching the PyTorch forward exactly (incl. full_att bias)."""
    att1 = encoder_out @ params["we"].T + params["be"][0]              # (B,P,A)
    att2 = decoder_hidden @ params["wd"].T + params["bd"][0]           # (B,A)
    h = jnp.maximum(att1 + att2[:, None, :], 0.0)
    att = (h @ params["wf"].T)[..., 0] + params["bf"][0, 0]            # (B,P)
    alpha = jax.nn.softmax(att, axis=1)
    awe = jnp.sum(encoder_out * alpha[:, :, None], axis=1)
    return awe, alpha


if __name__ == "__main__":
    # Small, forward-consistent shapes.
    B, P = 8, 16          # batch, num_pixels
    F, H, A = 32, 32, 32  # feature_dim, hidden_size, attention_dim

    key = jax.random.PRNGKey(0)
    k_enc, k_dec, k1, k2, k3, k4, k5, k6 = jax.random.split(key, 8)

    encoder_out = jax.random.normal(k_enc, (B, P, F), dtype=jnp.float32)
    decoder_hidden = jax.random.normal(k_dec, (B, H), dtype=jnp.float32)

    # Deterministic parameters (PyTorch Linear shapes: (out, in) weights).
    params = {
        "we": 0.1 * jax.random.normal(k1, (A, F), dtype=jnp.float32),
        "be": 0.1 * jax.random.normal(k2, (1, A), dtype=jnp.float32),
        "wd": 0.1 * jax.random.normal(k3, (A, H), dtype=jnp.float32),
        "bd": 0.1 * jax.random.normal(k4, (1, A), dtype=jnp.float32),
        "wf": 0.1 * jax.random.normal(k5, (1, A), dtype=jnp.float32),
        "bf": 0.1 * jax.random.normal(k6, (1, 1), dtype=jnp.float32),
    }

    awe, alpha = attention_forward(encoder_out, decoder_hidden, params)
    jax.block_until_ready((awe, alpha))

    awe_ref, alpha_ref = attention_reference(encoder_out, decoder_hidden, params)
    assert awe.shape == (B, F) and alpha.shape == (B, P)
    # bf16 MXU operands -> loosened tolerance vs the f32 reference.
    assert jnp.allclose(alpha, alpha_ref, atol=2e-2, rtol=2e-2)
    assert jnp.allclose(awe, awe_ref, atol=2e-2, rtol=2e-2)

    print("KERNEL_OK")
</pallas_src>

<mosaic_0001>
module attributes {stable_mosaic.version = 11 : i64} {
  func.func @attention_kernel(%arg0: i32, %arg1: memref<8x16x32xbf16, #tpu.memory_space<vmem>>, %arg2: memref<8x1x32xf32, #tpu.memory_space<vmem>>, %arg3: memref<32x32xbf16, #tpu.memory_space<vmem>>, %arg4: memref<1x32xf32, #tpu.memory_space<vmem>>, %arg5: memref<8x32xf32, #tpu.memory_space<vmem>>, %arg6: memref<8x16xf32, #tpu.memory_space<vmem>>) attributes {dimension_semantics = [#tpu.dimension_semantics<parallel>], iteration_bounds = array<i64: 1>, scalar_prefetch = 0 : i64, scratch_operands = 0 : i64, tpu.core_type = #tpu.core_type<tc>, window_params = [{transform_indices = @transform_0, window_bounds = array<i64: 8, 16, 32>}, {transform_indices = @transform_1, window_bounds = array<i64: 8, 1, 32>}, {pipeline_mode = #tpu.pipeline_mode<synchronous>, transform_indices = @transform_2, window_bounds = array<i64: 32, 32>}, {pipeline_mode = #tpu.pipeline_mode<synchronous>, transform_indices = @transform_3, window_bounds = array<i64: 1, 32>}, {transform_indices = @transform_4, window_bounds = array<i64: 8, 32>}, {transform_indices = @transform_5, window_bounds = array<i64: 8, 16>}]} {
    %c0 = arith.constant 0 : index
    %c0_0 = arith.constant 0 : index
    %c0_1 = arith.constant 0 : index
    %0 = vector.load %arg1[%c0, %c0_0, %c0_1] : memref<8x16x32xbf16, #tpu.memory_space<vmem>>, vector<8x16x32xbf16>
    %1 = vector.shape_cast %0 : vector<8x16x32xbf16> to vector<128x32xbf16>
    %c0_2 = arith.constant 0 : index
    %c0_3 = arith.constant 0 : index
    %2 = vector.load %arg3[%c0_2, %c0_3] : memref<32x32xbf16, #tpu.memory_space<vmem>>, vector<32x32xbf16>
    %cst = arith.constant dense<0.000000e+00> : vector<128x32xf32>
    %3 = tpu.matmul %1, %2, %cst {dimension_numbers = #tpu.dot_dimension_numbers<[1], [0], [0], [1], [0, 0, 1, 1], [], []>} : vector<128x32xbf16>, vector<32x32xbf16>, vector<128x32xf32> -> vector<128x32xf32>
    %4 = vector.shape_cast %3 : vector<128x32xf32> to vector<8x16x32xf32>
    %c0_4 = arith.constant 0 : index
    %c0_5 = arith.constant 0 : index
    %c0_6 = arith.constant 0 : index
    %5 = vector.load %arg2[%c0_4, %c0_5, %c0_6] : memref<8x1x32xf32, #tpu.memory_space<vmem>>, vector<8x1x32xf32>
    %6 = vector.broadcast %5 : vector<8x1x32xf32> to vector<8x16x32xf32>
    %7 = arith.addf %4, %6 : vector<8x16x32xf32>
    %cst_7 = arith.constant 0.000000e+00 : f32
    %8 = vector.broadcast %cst_7 : f32 to vector<8x16x32xf32>
    %9 = arith.maximumf %7, %8 : vector<8x16x32xf32>
    %c0_8 = arith.constant 0 : index
    %c0_9 = arith.constant 0 : index
    %10 = vector.load %arg4[%c0_8, %c0_9] : memref<1x32xf32, #tpu.memory_space<vmem>>, vector<1x32xf32>
    %11 = vector.shape_cast %10 : vector<1x32xf32> to vector<1x1x32xf32>
    %12 = vector.broadcast %11 : vector<1x1x32xf32> to vector<8x16x32xf32>
    %13 = arith.mulf %9, %12 : vector<8x16x32xf32>
    %cst_10 = arith.constant dense<0.000000e+00> : vector<8x16xf32>
    %14 = vector.multi_reduction <add>, %13, %cst_10 [2] : vector<8x16x32xf32> to vector<8x16xf32>
    %cst_11 = arith.constant dense<0xFF800000> : vector<8xf32>
    %15 = vector.multi_reduction <maximumf>, %14, %cst_11 [1] : vector<8x16xf32> to vector<8xf32>
    %16 = vector.shape_cast %15 : vector<8xf32> to vector<8x1xf32>
    %17 = vector.broadcast %16 : vector<8x1xf32> to vector<8x16xf32>
    %18 = arith.subf %14, %17 : vector<8x16xf32>
    %19 = math.exp %18 : vector<8x16xf32>
    %cst_12 = arith.constant dense<0.000000e+00> : vector<8xf32>
    %20 = vector.multi_reduction <add>, %19, %cst_12 [1] : vector<8x16xf32> to vector<8xf32>
    %21 = vector.shape_cast %20 : vector<8xf32> to vector<8x1xf32>
    %22 = tpu.reciprocal %21 {approx = true} : vector<8x1xf32> -> vector<8x1xf32>
    %23 = arith.mulf %21, %22 : vector<8x1xf32>
    %cst_13 = arith.constant 2.000000e+00 : f32
    %24 = vector.broadcast %cst_13 : f32 to vector<8x1xf32>
    %25 = arith.subf %24, %23 : vector<8x1xf32>
    %26 = arith.mulf %22, %25 : vector<8x1xf32>
    %27 = vector.broadcast %26 : vector<8x1xf32> to vector<8x16xf32>
    %28 = arith.mulf %19, %27 : vector<8x16xf32>
    %c0_14 = arith.constant 0 : index
    %c0_15 = arith.constant 0 : index
    %29 = vector.load %arg6[%c0_14, %c0_15] : memref<8x16xf32, #tpu.memory_space<vmem>>, vector<8x16xf32>
    tpu.vector_store %arg6[%c0_14, %c0_15], %28 {strides = array<i32>} : memref<8x16xf32, #tpu.memory_space<vmem>>, vector<8x16xf32>,
    %30 = arith.extf %0 : vector<8x16x32xbf16> to vector<8x16x32xf32>
    %31 = vector.shape_cast %28 : vector<8x16xf32> to vector<8x16x1xf32>
    %32 = vector.broadcast %31 : vector<8x16x1xf32> to vector<8x16x32xf32>
    %33 = arith.mulf %30, %32 : vector<8x16x32xf32>
    %cst_16 = arith.constant dense<0.000000e+00> : vector<8x32xf32>
    %34 = vector.multi_reduction <add>, %33, %cst_16 [1] : vector<8x16x32xf32> to vector<8x32xf32>
    %c0_17 = arith.constant 0 : index
    %c0_18 = arith.constant 0 : index
    %35 = vector.load %arg5[%c0_17, %c0_18] : memref<8x32xf32, #tpu.memory_space<vmem>>, vector<8x32xf32>
    tpu.vector_store %arg5[%c0_17, %c0_18], %34 {strides = array<i32>} : memref<8x32xf32, #tpu.memory_space<vmem>>, vector<8x32xf32>,
    return
  }
  func.func @transform_0(%arg0: i32) -> (i32, i32, i32) {
    %c0_i32 = arith.constant 0 : i32
    %c0_i32_0 = arith.constant 0 : i32
    %c0_i32_1 = arith.constant 0 : i32
    return %arg0, %c0_i32, %c0_i32_0 : i32, i32, i32
  }
  func.func @transform_1(%arg0: i32) -> (i32, i32, i32) {
    %c0_i32 = arith.constant 0 : i32
    %c0_i32_0 = arith.constant 0 : i32
    %c0_i32_1 = arith.constant 0 : i32
    return %arg0, %c0_i32, %c0_i32_0 : i32, i32, i32
  }
  func.func @transform_2(%arg0: i32) -> (i32, i32) {
    %c0_i32 = arith.constant 0 : i32
    %c0_i32_0 = arith.constant 0 : i32
    %c0_i32_1 = arith.constant 0 : i32
    return %c0_i32, %c0_i32_0 : i32, i32
  }
  func.func @transform_3(%arg0: i32) -> (i32, i32) {
    %c0_i32 = arith.constant 0 : i32
    %c0_i32_0 = arith.constant 0 : i32
    %c0_i32_1 = arith.constant 0 : i32
    return %c0_i32, %c0_i32_0 : i32, i32
  }
  func.func @transform_4(%arg0: i32) -> (i32, i32) {
    %c0_i32 = arith.constant 0 : i32
    %c0_i32_0 = arith.constant 0 : i32
    return %arg0, %c0_i32 : i32, i32
  }
  func.func @transform_5(%arg0: i32) -> (i32, i32) {
    %c0_i32 = arith.constant 0 : i32
    %c0_i32_0 = arith.constant 0 : i32
    return %arg0, %c0_i32 : i32, i32
  }
}

</mosaic_0001>

<bundles_post_ra>
// kernel: tpu_custom_call.1
= control target key start
LH: loop header
LB: loop body
LE: loop exit
PB: predicated region body
PF: predicated region fallthrough
CT: control target
= control target key end

     0   :  { %11 = vsyncpa [#allocation3], 0  ;;  %s1912_s0 = inlined_call_operand.hbm [shape: bf16[8,16,32], index: 0, kind: input, shape index: {}]   ;;  %s1913_s1 = inlined_call_operand.hbm [shape: f32[8,1,32], index: 1, kind: input, shape index: {}]   ;;  %s1914_s2 = inlined_call_operand.hbm [shape: bf16[32,32], index: 2, kind: input, shape index: {}]   ;;  %s1915_s3 = inlined_call_operand.vmem [shape: f32[1,32], index: 3, kind: input, shape index: {}]   ;;  %s1916_s4 = inlined_call_operand.hbm [shape: f32[8,32], index: 4, kind: output, shape index: {0}]   ;;  %s1917_s5 = inlined_call_operand.hbm [shape: f32[8,16], index: 5, kind: output, shape index: {1}]  }
   0x1   :  { %12 = vsyncpa [#allocation6], 0 }
   0x2   :  { %13 = vsyncpa [#allocation4], 0 }
   0x3   :  { %14 = vsyncpa [#allocation10], 0  ;;  %s1379_s18 = smov [#allocation5]   ;;  %s1261_s22 = scalar_lea.hbm %s1913_s1, 128 }
   0x4   :  { %s32_s19 = sshll.u32 %s1379_s18, 4  ;;  %p1262_p0 = scmp.ne.s32.totalorder %s1913_s1, %s1261_s22  ;;  %s33_s19 = int_to_ptr.vmem [resolvable:$true] %s32_s19 }
   0x5   :  { %p1265_p1 = scmp.lt.u32.totalorder %s1261_s22, %s1913_s1 }
   0x7   :  { %p1267_p2 = pnand %p1265_p1, %p1262_p0 }
   0x9   :  { %1270 = shalt.err (!%p1267_p2)
}
   0xa   :  { %s1271_s27 = scalar_lea.vmem %s33_s19, 128  ;;  %p1276_p4 = scmp.lt.s32.totalorder %s33_s19, %s33_s19 }
   0xb   :  { %p1272_p3 = scmp.ne.s32.totalorder %s33_s19, %s1271_s27  ;;  %p1277_p5 = scmp.lt.s32.totalorder %s1271_s27, %s1271_s27 }
   0xd   :  { %p1278_p6 = por %p1277_p5, %p1276_p4 }
   0xf   :  { %p1279_p7 = pnand %p1278_p6, %p1272_p3 }
  0x11   :  { %1282 = shalt.err (!%p1279_p7)
}
  0x12   :  { %s1380_s28 = smov 16   ;;  %s1381_s29 = smov 1  }
  0x13   :  { %38 = dma.hbm_to_vmem [thread:$0]  %s1913_s1, 128, %s33_s19, [#allocation6], %s1380_s28, %s1380_s28, %s1381_s29  }
  0x14   :  { %s1382_s7 = smov [#allocation2]   ;;  %s1283_s11 = scalar_lea.hbm %s1912_s0, 1024 }
  0x15   :  { %s20_s8 = sshll.u32 %s1382_s7, 4  ;;  %p1284_p8 = scmp.ne.s32.totalorder %s1912_s0, %s1283_s11  ;;  %s21_s8 = int_to_ptr.vmem [resolvable:$true] %s20_s8 }
  0x16   :  { %p1287_p9 = scmp.lt.u32.totalorder %s1283_s11, %s1912_s0 }
  0x18   :  { %p1289_p10 = pnand %p1287_p9, %p1284_p8 }
  0x1a   :  { %1292 = shalt.err (!%p1289_p10)
}
  0x1b   :  { %s1293_s16 = scalar_lea.vmem %s21_s8, 1024  ;;  %p1298_p12 = scmp.lt.s32.totalorder %s21_s8, %s21_s8 }
  0x1c   :  { %p1294_p11 = scmp.ne.s32.totalorder %s21_s8, %s1293_s16  ;;  %p1299_p13 = scmp.lt.s32.totalorder %s1293_s16, %s1293_s16 }
  0x1e   :  { %p1300_p0 = por %p1299_p13, %p1298_p12 }
  0x20   :  { %p1301_p1 = pnand %p1300_p0, %p1294_p11 }
  0x22   :  { %1304 = shalt.err (!%p1301_p1)
}
  0x23   :  { %s1383_s1 = smov 64   ;;  %s1384_s17 = smov 4  }
  0x24   :  { %26 = dma.hbm_to_vmem [thread:$0]  %s1912_s0, 1024, %s21_s8, [#allocation3], %s1383_s1, %s1383_s1, %s1384_s17  }
  0x25   :  { %s1385_s20 = smov [#allocation7]   ;;  %s1305_s24 = scalar_lea.hbm %s1914_s2, 256 }
  0x26   :  { %s44_s21 = sshll.u32 %s1385_s20, 4  ;;  %p1306_p2 = scmp.ne.s32.totalorder %s1914_s2, %s1305_s24  ;;  %s45_s21 = int_to_ptr.vmem [resolvable:$true] %s44_s21 }
  0x27   :  { %p1309_p3 = scmp.lt.u32.totalorder %s1305_s24, %s1914_s2 }
  0x29   :  { %p1311_p4 = pnand %p1309_p3, %p1306_p2 }
  0x2b   :  { %1314 = shalt.err (!%p1311_p4)
}
  0x2c   :  { %s1315_s29 = scalar_lea.vmem %s45_s21, 256  ;;  %p1320_p6 = scmp.lt.s32.totalorder %s45_s21, %s45_s21 }
  0x2d   :  { %p1316_p5 = scmp.ne.s32.totalorder %s45_s21, %s1315_s29  ;;  %p1321_p7 = scmp.lt.s32.totalorder %s1315_s29, %s1315_s29 }
  0x2f   :  { %p1322_p8 = por %p1321_p7, %p1320_p6 }
  0x31   :  { %p1323_p9 = pnand %p1322_p8, %p1316_p5 }
  0x33   :  { %1326 = shalt.err (!%p1323_p9)
}
  0x34   :  { %50 = dma.hbm_to_vmem [thread:$0]  %s1914_s2, 256, %s45_s21, [#allocation6], %s1383_s1, %s1383_s1, %s1384_s17  }
  0x35   :  { %1371 = dma.done.wait [#allocation3], 1024  }
  0x36   :  { %1372 = vsyncadd [#allocation3], 4294966272 }
  0x37   :  { %1373 = dma.done.wait [#allocation6], 384  }
  0x38   :  { %1374 = vsyncadd [#allocation6], 4294966912  ;;  %v1209_v0 = vld [vmem:[#allocation7] sm:$0xff]   ;;  %v1210_v1 = vld [vmem:[#allocation7 + $0x8] sm:$0xff]   ;;  %vm135_vm0 = vcmask 261120   ;;  %vm443_vm1 = vcmask 130112  }
  0x39   :  { %1173 = vmatprep.subr.bf16.mxu0 %v1209_v0  ;;  %1193 = vmatprep.subr.bf16.mxu1 %v1209_v0  ;;  %v1455_v2 = vld [vmem:[#allocation2] sm:$0xff]   ;;  %v1459_v4 = vld [vmem:[#allocation2 + $0x8] sm:$0xff]   ;;  %v1463_v6 = vld [vmem:[#allocation2 + $0x10] sm:$0xff]   ;;  %vm508_vm2 = vcmask 1041409   ;;  %vm510_vm3 = vcmask 1042434   ;;  %vm512_vm4 = vcmask 1043459  }
  0x3a   :  { %v1457_v3 = vld [vmem:[#allocation2 + $0x20] sm:$0xff]   ;;  %1174 = vmatpush3.bf16.msra.mxu0 %v1209_v0  ;;  %1195 = vmatpush3.bf16.msra.mxu1 %v1209_v0  ;;  %v1461_v5 = vld [vmem:[#allocation2 + $0x28] sm:$0xff]   ;;  %v1465_v7 = vld [vmem:[#allocation2 + $0x30] sm:$0xff]   ;;  %vm514_vm5 = vcmask 1044484   ;;  %vm516_vm6 = vcmask 1045509   ;;  %vm518_vm7 = vcmask 1046534  }
  0x3b   :  { %1175 = vmatprep.subr.bf16.mxu0 %v1210_v1  ;;  %1194 = vmatprep.subr.bf16.mxu1 %v1210_v1  ;;  %v1477_v8 = vld [vmem:[#allocation2 + $0x18] sm:$0xff]   ;;  %v1155_v10 = vld [vmem:[#allocation5 + $0x1] ss:$0 sm:$0xff]  ;;  %v1159_v11 = vld [vmem:[#allocation5 + $0x5] ss:$0 sm:$0xff]  ;;  %vm520_vm8 = vcmask 1047559  }
  0x3c   :  { %1177 = vmatprep.mubr.msk.bf16.mxu0 %vm135_vm0, %v1455_v2  ;;  %1185 = vmatprep.mubr.msk.bf16.mxu1 %vm135_vm0, %v1457_v3  ;;  %v1481_v9 = vld [vmem:[#allocation2 + $0x38] sm:$0xff]   ;;  %v1154_v12 = vld [vmem:[#allocation5] ss:$0 sm:$0xff]  ;;  %v1158_v13 = vld [vmem:[#allocation5 + $0x4] ss:$0 sm:$0xff]  ;;  %vm523_vm9 = vcmask 130048  }
  0x3d   :  { %v1490_v24 = vld [vmem:[%s1915_s3] ss:$0 sm:$0xff]  ;;  %v1157_v44 = vld [vmem:[#allocation5 + $0x3] ss:$0 sm:$0xff]  ;;  %v1156_v60 = vld [vmem:[#allocation5 + $0x2] ss:$0 sm:$0xff] }
  0x3e   :  { %1176 = vmatpush3.bf16.msra.mxu0 %v1210_v1  ;;  %1196 = vmatpush3.bf16.msra.mxu1 %v1210_v1  ;;  %s1387_s3 = smov [#allocation9]  }
  0x3f   :  { %s1122_s7 = sshll.u32 %s1387_s3, 4  ;;  %s1123_s7 = int_to_ptr.vmem [resolvable:$true] %s1122_s7 }
  0x40   :  { %s1327_s8 = scalar_lea.vmem %s1123_s7, 128  ;;  %p1332_p11 = scmp.lt.s32.totalorder %s1123_s7, %s1123_s7 }
  0x41   :  { %1178 = vmatmul.mubr.msk.bf16.vlgmr.msra.gmra.mrb[0].mxu0 %vm135_vm0, %v1459_v4  ;;  %1186 = vmatmul.mubr.msk.bf16.vlgmr.msra.gmra.mrb[0].mxu1 %vm135_vm0, %v1461_v5  ;;  %p1328_p10 = scmp.ne.s32.totalorder %s1123_s7, %s1327_s8  ;;  %p1333_p12 = scmp.lt.s32.totalorder %s1327_s8, %s1327_s8 }
  0x42   :  { %1181 = vmatprep.mubr.msk.bf16.mxu0 %vm135_vm0, %v1463_v6  ;;  %1189 = vmatprep.mubr.msk.bf16.mxu1 %vm135_vm0, %v1465_v7 }
  0x43   :  { %p1334_p13 = por %p1333_p12, %p1332_p11 }
  0x45   :  { %p1335_p0 = pnand %p1334_p13, %p1328_p10 }
  0x49   :  { %1182 = vmatmul.mubr.msk.bf16.gmra.mrb[4].mxu0 %vm135_vm0, %v1477_v8  ;;  %1190 = vmatmul.mubr.msk.bf16.gmra.mrb[4].mxu1 %vm135_vm0, %v1481_v9 }
 0x114   :  { %v1179_v14 = vpop.f32.mrb[0].mxu0  ;;  %v1187_v15 = vpop.f32.mrb[0].mxu1 }
 0x115   :  { %v315_v16 = vadd.f32 %v1179_v14, %v1155_v10  ;;  %v323_v17 = vadd.f32 %v1187_v15, %v1159_v11  ;;  %v194_v18 = vpop.f32.mrb[1].mxu0  ;;  %v226_v19 = vpop.f32.mrb[1].mxu1 }
 0x116   :  { %v313_v20 = vadd.f32 %v1154_v12, %v194_v18  ;;  %v321_v21 = vadd.f32 %v1158_v13, %v226_v19  ;;  %v1180_v22 = vpop.f32.mrb[2].mxu0  ;;  %v1188_v23 = vpop.f32.mrb[2].mxu1 }
 0x117   :  { %v331_v25 = vmax.f32 %v315_v16, 0.0  ;;  %v339_v26 = vmax.f32 %v323_v17, 0.0  ;;  %v316_v27 = vadd.f32 %v1180_v22, %v1155_v10  ;;  %v324_v28 = vadd.f32 %v1188_v23, %v1159_v11  ;;  %v197_v29 = vpop.f32.mrb[3].mxu0  ;;  %v229_v30 = vpop.f32.mrb[3].mxu1 }
 0x118   :  { %v329_v31 = vmax.f32 %v313_v20, 0.0  ;;  %v337_v35 = vmax.f32 %v321_v21, 0.0  ;;  %v314_v37 = vadd.f32 %v1154_v12, %v197_v29  ;;  %v322_v38 = vadd.f32 %v1158_v13, %v229_v30  ;;  %v1160_v13 = vld [vmem:[#allocation5 + $0x6] ss:$0 sm:$0xff]  ;;  %v1161_v20 = vld [vmem:[#allocation5 + $0x7] ss:$0 sm:$0xff] }
 0x119   :  { %v332_v32 = vmax.f32 %v316_v27, 0.0  ;;  %v362_v33 = vmul.f32 %v1490_v24, %v339_v26  ;;  %v354_v34 = vmul.f32 %v1490_v24, %v331_v25  ;;  %v340_v36 = vmax.f32 %v324_v28, 0.0 }
 0x11a   :  { %v352_v41 = vmul.f32 %v1490_v24, %v329_v31  ;;  %v330_v48 = vmax.f32 %v314_v37, 0.0  ;;  %v338_v49 = vmax.f32 %v322_v38, 0.0  ;;  %v360_v51 = vmul.f32 %v1490_v24, %v337_v35 }
 0x11b   :  { %v398_v39 = vsel %vm135_vm0, %v362_v33, 0.0  ;;  %v374_v40 = vsel %vm135_vm0, %v354_v34, 0.0  ;;  %v355_v42 = vmul.f32 %v1490_v24, %v332_v32  ;;  %v363_v52 = vmul.f32 %v1490_v24, %v340_v36 }
 0x11c   :  { %399 = vadd.xlane.f32.xlu0 %v398_v39  ;;  %375 = vadd.xlane.f32.xlu1 %v374_v40  ;;  %v1183_v43 = vpop.f32.mrb[4].mxu0  ;;  %v1191_v45 = vpop.f32.mrb[4].mxu1  ;;  %v368_v55 = vsel %vm135_vm0, %v352_v41, 0.0  ;;  %v392_v61 = vsel %vm135_vm0, %v360_v51, 0.0  ;;  %v361_v63 = vmul.f32 %v1490_v24, %v338_v49  ;;  %v353_v0 = vmul.f32 %v1490_v24, %v330_v48 }
 0x11d   :  { %v210_v46 = vpop.f32.mrb[5].mxu0  ;;  %v242_v47 = vpop.f32.mrb[5].mxu1  ;;  %v319_v54 = vadd.f32 %v1183_v43, %v1157_v44  ;;  %v377_v56 = vsel %vm135_vm0, %v355_v42, 0.0  ;;  %v401_v62 = vsel %vm135_vm0, %v363_v52, 0.0  ;;  %v327_v23 = vadd.f32 %v1191_v45, %v1161_v20 }
 0x11e   :  { %v1184_v50 = vpop.f32.mrb[6].mxu0  ;;  %v1192_v53 = vpop.f32.mrb[6].mxu1  ;;  %v317_v10 = vadd.f32 %v1156_v60, %v210_v46  ;;  %v325_v14 = vadd.f32 %v1160_v13, %v242_v47  ;;  %v395_v15 = vsel %vm135_vm0, %v361_v63, 0.0  ;;  %v371_v16 = vsel %vm135_vm0, %v353_v0, 0.0 }
 0x11f   :  { %v320_v57 = vadd.f32 %v1184_v50, %v1157_v44  ;;  %v213_v58 = vpop.f32.mrb[7].mxu0  ;;  %v245_v59 = vpop.f32.mrb[7].mxu1  ;;  %v335_v1 = vmax.f32 %v319_v54, 0.0  ;;  %v328_v26 = vadd.f32 %v1192_v53, %v1161_v20  ;;  %v343_v32 = vmax.f32 %v327_v23, 0.0 }
 0x120   :  { %369 = vadd.xlane.f32.xlu0 %v368_v55  ;;  %378 = vadd.xlane.f32.xlu1 %v377_v56  ;;  %v318_v12 = vadd.f32 %v1156_v60, %v213_v58  ;;  %v326_v17 = vadd.f32 %v1160_v13, %v245_v59  ;;  %v333_v18 = vmax.f32 %v317_v10, 0.0  ;;  %v341_v25 = vmax.f32 %v325_v14, 0.0 }
 0x121   :  { %v336_v11 = vmax.f32 %v320_v57, 0.0  ;;  %v358_v21 = vmul.f32 %v1490_v24, %v335_v1  ;;  %v344_v33 = vmax.f32 %v328_v26, 0.0  ;;  %v366_v40 = vmul.f32 %v1490_v24, %v343_v32 }
 0x122   :  { %v334_v19 = vmax.f32 %v318_v12, 0.0  ;;  %v342_v27 = vmax.f32 %v326_v17, 0.0  ;;  %v356_v30 = vmul.f32 %v1490_v24, %v333_v18  ;;  %v364_v36 = vmul.f32 %v1490_v24, %v341_v25 }
 0x123   :  { %v359_v22 = vmul.f32 %v1490_v24, %v336_v11  ;;  %v386_v28 = vsel %vm135_vm0, %v358_v21, 0.0  ;;  %v367_v41 = vmul.f32 %v1490_v24, %v344_v33  ;;  %v410_v42 = vsel %vm135_vm0, %v366_v40, 0.0 }
 0x124   :  { %393 = vadd.xlane.f32.xlu0 %v392_v61  ;;  %402 = vadd.xlane.f32.xlu1 %v401_v62  ;;  %v357_v31 = vmul.f32 %v1490_v24, %v334_v19  ;;  %v380_v34 = vsel %vm135_vm0, %v356_v30, 0.0  ;;  %v365_v37 = vmul.f32 %v1490_v24, %v342_v27  ;;  %v404_v38 = vsel %vm135_vm0, %v364_v36, 0.0 }
 0x125   :  { %v389_v29 = vsel %vm135_vm0, %v359_v22, 0.0  ;;  %v413_v43 = vsel %vm135_vm0, %v367_v41, 0.0  ;;  %v432_v46 = vlaneseq }
 0x126   :  { %v383_v35 = vsel %vm135_vm0, %v357_v31, 0.0  ;;  %v407_v39 = vsel %vm135_vm0, %v365_v37, 0.0 }
 0x127   :  { %v433_v49 = vand.u32 127, %v432_v46  ;;  %v1536_v52 = vshrl.u32 %v432_v46, 7 }
 0x128   :  { %396 = vadd.xlane.f32.xlu1 %v395_v15  ;;  %372 = vadd.xlane.f32.xlu0 %v371_v16 }
 0x129   :  { %v438_v51 = vadd.s32 4294967288, %v433_v49  ;;  %v1546_v56 = vsub.s32 %v433_v49, %v1536_v52  ;;  %v534_v46 = vsub.s32 1, %v1536_v52 }
 0x12b   :  { %v1543_v55 = vsub.s32 %v438_v51, %v1536_v52 }
 0x12c   :  { %387 = vadd.xlane.f32.xlu0 %v386_v28  ;;  %390 = vadd.xlane.f32.xlu1 %v389_v29 }
 0x130   :  { %381 = vadd.xlane.f32.xlu0 %v380_v34  ;;  %384 = vadd.xlane.f32.xlu1 %v383_v35 }
 0x134   :  { %405 = vadd.xlane.f32.xlu0 %v404_v38  ;;  %408 = vadd.xlane.f32.xlu1 %v407_v39 }
 0x138   :  { %411 = vadd.xlane.f32.xlu0 %v410_v42  ;;  %414 = vadd.xlane.f32.xlu1 %v413_v43  ;;  %v1386_v42 = vmov 0   ;;  %v530_v43 = vsub.s32 0, %v1536_v52 }
 0x139   :  { %1208 = vset.pattern.permute.xlu0 %v1386_v42  ;;  %1207 = vset.pattern.permute.xlu1 %v1386_v42 }
 0x1a9   :  { %v1524_v44 = vpop.xlane.xlu0 %399  ;;  %v1526_v45 = vpop.xlane.xlu1 %375 }
 0x1aa   :  { %v448_v62 = vrot.slane %v1526_v45, %v1546_v56  ;;  %v484_v20 = vrot.slane %v1524_v44, %v1546_v56 }
 0x1ad   :  { %v1528_v47 = vpop.xlane.xlu0 %369  ;;  %v1530_v48 = vpop.xlane.xlu1 %378 }
 0x1ae   :  { %v437_v60 = vrot.slane %v1528_v47, %v1546_v56  ;;  %v452_v61 = vrot.slane %v1530_v48, %v1543_v55 }
 0x1b0   :  { %v453_v15 = vsel %vm443_vm1, %v452_v61, %v448_v62 }
 0x1b1   :  { %v1532_v50 = vpop.xlane.xlu0 %393  ;;  %v1534_v24 = vpop.xlane.xlu1 %402 }
 0x1b2   :  { %v475_v16 = vrot.slane %v1532_v50, %v1546_v56  ;;  %v488_v17 = vrot.slane %v1534_v24, %v1543_v55 }
 0x1b4   :  { %v489_v31 = vsel %vm443_vm1, %v488_v17, %v484_v20 }
 0x1b5   :  { %v1538_v53 = vpop.xlane.xlu1 %396  ;;  %v1540_v54 = vpop.xlane.xlu0 %372 }
 0x1b6   :  { %v442_v57 = vrot.slane %v1540_v54, %v1543_v55  ;;  %v479_v12 = vrot.slane %v1538_v53, %v1543_v55 }
 0x1b8   :  { %v444_v63 = vsel %vm443_vm1, %v442_v57, %v437_v60  ;;  %v480_v26 = vsel %vm443_vm1, %v479_v12, %v475_v16  ;;  %v550_v60 = vsub.s32 5, %v1536_v52 }
 0x1b9   :  { %v1550_v58 = vpop.xlane.xlu0 %387  ;;  %v1552_v59 = vpop.xlane.xlu1 %390  ;;  %v509_v18 = vsel %vm508_vm2, %v453_v15, %v444_v63  ;;  %v538_v63 = vsub.s32 2, %v1536_v52 }
 0x1ba   :  { %v466_v0 = vrot.slane %v1550_v58, %v1546_v56  ;;  %v470_v1 = vrot.slane %v1552_v59, %v1543_v55 }
 0x1bc   :  { %v471_v21 = vsel %vm443_vm1, %v470_v1, %v466_v0  ;;  %v554_v1 = vsub.s32 6, %v1536_v52 }
 0x1bd   :  { %v1565_v10 = vpop.xlane.xlu0 %381  ;;  %v1567_v11 = vpop.xlane.xlu1 %384 }
 0x1be   :  { %v457_v13 = vrot.slane %v1565_v10, %v1546_v56  ;;  %v461_v14 = vrot.slane %v1567_v11, %v1543_v55 }
 0x1c0   :  { %v462_v19 = vsel %vm443_vm1, %v461_v14, %v457_v13 }
 0x1c1   :  { %v511_v22 = vsel %vm510_vm3, %v462_v19, %v509_v18  ;;  %v406_v23 = vpop.xlane.xlu0 %405  ;;  %v1586_v25 = vpop.xlane.xlu1 %408  ;;  %v542_v18 = vsub.s32 3, %v1536_v52 }
 0x1c2   :  { %v493_v27 = vrot.slane %v406_v23, %v1546_v56  ;;  %v497_v28 = vrot.slane %v1586_v25, %v1543_v55  ;;  %v513_v29 = vsel %vm512_vm4, %v471_v21, %v511_v22 }
 0x1c3   :  { %v515_v30 = vsel %vm514_vm5, %v480_v26, %v513_v29 }
 0x1c4   :  { %v498_v34 = vsel %vm443_vm1, %v497_v28, %v493_v27  ;;  %v517_v35 = vsel %vm516_vm6, %v489_v31, %v515_v30 }
 0x1c5   :  { %v1595_v32 = vpop.xlane.xlu0 %411  ;;  %v1597_v33 = vpop.xlane.xlu1 %414  ;;  %v519_v39 = vsel %vm518_vm7, %v498_v34, %v517_v35 }
 0x1c6   :  { %v502_v36 = vrot.slane %v1595_v32, %v1546_v56  ;;  %v506_v37 = vrot.slane %v1597_v33, %v1543_v55 }
 0x1c8   :  { %v507_v38 = vsel %vm443_vm1, %v506_v37, %v502_v36 }
 0x1c9   :  { %v521_v40 = vsel %vm520_vm8, %v507_v38, %v519_v39 }
 0x1ca   :  { %v524_v41 = vsel %vm523_vm9, %v521_v40, -inf }
 0x1cb   :  { %525 = vmax.xlane.f32.xlu0 %v524_v41 }
 0x258   :  { %v526_v49 = vpop.xlane.xlu0 %525 }
 0x259   :  { %v531_v51 = vrot.slane %v526_v49, %v530_v43  ;;  %v535_v57 = vrot.slane %v526_v49, %v534_v46  ;;  %v1623_v12 = vrot.slane %v526_v49, %v550_v60  ;;  %v539_v15 = vrot.slane %v526_v49, %v538_v63 }
 0x25a   :  { %v543_v26 = vrot.slane %v526_v49, %v542_v18 }
 0x25b   :  { %v568_v61 = vsub.f32 %v1528_v47, %v531_v51  ;;  %v569_v62 = vsub.f32 %v1540_v54, %v531_v51  ;;  %v570_v0 = vsub.f32 %v1526_v45, %v535_v57  ;;  %v571_v16 = vsub.f32 %v1530_v48, %v535_v57 }
 0x25c   :  { %v558_v54 = vsub.s32 7, %v1536_v52  ;;  %v1631_v45 = vrot.slane %v526_v49, %v554_v1  ;;  %v578_v17 = vsub.f32 %v1524_v44, %v1623_v12  ;;  %v572_v19 = vsub.f32 %v1565_v10, %v539_v15 }
 0x25d   :  { %v584_v13 = vmul.f32 1.442695, %v568_v61  ;;  %v586_v14 = vmul.f32 1.442695, %v569_v62  ;;  %v588_v47 = vmul.f32 1.442695, %v570_v0  ;;  %v573_v27 = vsub.f32 %v1567_v11, %v539_v15 }
 0x25e   :  { %v590_v20 = vmul.f32 1.442695, %v571_v16  ;;  %v559_v48 = vrot.slane %v526_v49, %v558_v54  ;;  %v580_v21 = vsub.f32 %v406_v23, %v1631_v45  ;;  %v604_v22 = vmul.f32 1.442695, %v578_v17 }
 0x25f   :  { %1227 = vpow2.f32 %v584_v13  ;;  %v592_v28 = vmul.f32 1.442695, %v572_v19  ;;  %v546_v23 = vsub.s32 4, %v1536_v52  ;;  %v574_v31 = vsub.f32 %v1550_v58, %v543_v26 }
 0x260   :  { %1229 = vpow2.f32 %v586_v14  ;;  %v582_v29 = vsub.f32 %v1595_v32, %v559_v48  ;;  %v608_v10 = vmul.f32 1.442695, %v580_v21  ;;  %v594_v34 = vmul.f32 1.442695, %v573_v27 }
 0x261   :  { %1231 = vpow2.f32 %v588_v47  ;;  %v547_v32 = vrot.slane %v526_v49, %v546_v23  ;;  %v575_v36 = vsub.f32 %v1552_v59, %v543_v26  ;;  %v596_v37 = vmul.f32 1.442695, %v574_v31 }
 0x262   :  { %1233 = vpow2.f32 %v590_v20  ;;  %v612_v35 = vmul.f32 1.442695, %v582_v29  ;;  %v579_v57 = vsub.f32 %v1534_v24, %v1623_v12  ;;  %v583_v14 = vsub.f32 %v1597_v33, %v559_v48 }
 0x263   :  { %1235 = vpow2.f32 %v604_v22  ;;  %v576_v39 = vsub.f32 %v1532_v50, %v547_v32  ;;  %v598_v40 = vmul.f32 1.442695, %v575_v36  ;;  %v577_v42 = vsub.f32 %v1538_v53, %v547_v32 }
 0x264   :  { %1237 = vpow2.f32 %v592_v28  ;;  %v581_v53 = vsub.f32 %v1586_v25, %v1631_v45  ;;  %v606_v0 = vmul.f32 1.442695, %v579_v57  ;;  %v614_v15 = vmul.f32 1.442695, %v583_v14 }
 0x265   :  { %1239 = vpow2.f32 %v608_v10  ;;  %v600_v49 = vmul.f32 1.442695, %v576_v39  ;;  %v602_v61 = vmul.f32 1.442695, %v577_v42  ;;  %v970_v52 = vunpack.c.h.bf16 %v1455_v2 }
 0x266   :  { %1241 = vpow2.f32 %v594_v34  ;;  %v610_v24 = vmul.f32 1.442695, %v581_v53 }
 0x267   :  { %1243 = vpow2.f32 %v612_v35 }
 0x268   :  { %1245 = vpow2.f32 %v596_v37 }
 0x269   :  { %v1643_v44 = vpop.eup %1227  ;;  %1247 = vpow2.f32 %v598_v40 }
 0x26a   :  { %v1646_v30 = vpop.eup %1229  ;;  %633 = vperm.xlu1 %1207, %v1643_v44   ;;  %1249 = vpow2.f32 %v600_v49 }
 0x26b   :  { %636 = vperm.xlu0 %1208, %v1646_v30   ;;  %v1652_v11 = vpop.eup %1231  ;;  %1251 = vpow2.f32 %v602_v61 }
 0x26c   :  { %v1658_v38 = vpop.eup %1233  ;;  %1253 = vpow2.f32 %v606_v0 }
 0x26d   :  { %v1661_v58 = vpop.eup %1235  ;;  %1255 = vpow2.f32 %v610_v24 }
 0x26e   :  { %639 = vperm.xlu1 %1207, %v1652_v11   ;;  %v1665_v41 = vpop.eup %1237  ;;  %1257 = vpow2.f32 %v614_v15 }
 0x26f   :  { %663 = vperm.xlu0 %1208, %v1661_v58   ;;  %v1668_v59 = vpop.eup %1239 }
 0x270   :  { %v1672_v51 = vpop.eup %1241 }
 0x271   :  { %v1675_v50 = vpop.eup %1243 }
 0x272   :  { %642 = vperm.xlu1 %1207, %v1658_v38   ;;  %v1680_v62 = vpop.eup %1245 }
 0x273   :  { %669 = vperm.xlu0 %1208, %v1668_v59   ;;  %v1685_v13 = vpop.eup %1247 }
 0x274   :  { %v1689_v12 = vpop.eup %1249 }
 0x275   :  { %v1692_v16 = vpop.eup %1251 }
 0x276   :  { %645 = vperm.xlu1 %1207, %v1665_v41   ;;  %v1695_v25 = vpop.eup %1253 }
 0x277   :  { %675 = vperm.xlu0 %1208, %v1675_v50   ;;  %v1698_v47 = vpop.eup %1255 }
 0x278   :  { %v1701_v33 = vpop.eup %1257 }
 0x27a   :  { %648 = vperm.xlu1 %1207, %v1672_v51  }
 0x27e   :  { %651 = vperm.xlu1 %1207, %v1680_v62  }
 0x282   :  { %654 = vperm.xlu1 %1207, %v1685_v13  }
 0x286   :  { %657 = vperm.xlu1 %1207, %v1689_v12  }
 0x28a   :  { %660 = vperm.xlu1 %1207, %v1692_v16  }
 0x28e   :  { %666 = vperm.xlu1 %1207, %v1695_v25  }
 0x292   :  { %672 = vperm.xlu1 %1207, %v1698_v47  }
 0x296   :  { %678 = vperm.xlu1 %1207, %v1701_v33  }
 0x2e9   :  { %v634_v45 = vpop.permute.xlu1 %633 }
 0x2ea   :  { %v637_v22 = vpop.permute.xlu0 %636  ;;  %v683_v36 = vrot.slane %v634_v45, %v1546_v56 }
 0x2eb   :  { %v687_v32 = vrot.slane %v637_v22, %v1543_v55 }
 0x2ed   :  { %v640_v17 = vpop.permute.xlu1 %639  ;;  %v688_v24 = vsel %vm443_vm1, %v687_v32, %v683_v36 }
 0x2ee   :  { %v664_v28 = vpop.permute.xlu0 %663  ;;  %v692_v37 = vrot.slane %v640_v17, %v1546_v56 }
 0x2ef   :  { %v728_v15 = vrot.slane %v664_v28, %v1546_v56 }
 0x2f1   :  { %v643_v19 = vpop.permute.xlu1 %642 }
 0x2f2   :  { %v696_v10 = vrot.slane %v643_v19, %v1543_v55  ;;  %v670_v31 = vpop.permute.xlu0 %669 }
 0x2f3   :  { %v737_v19 = vrot.slane %v670_v31, %v1546_v56 }
 0x2f4   :  { %v697_v49 = vsel %vm443_vm1, %v696_v10, %v692_v37 }
 0x2f5   :  { %v646_v20 = vpop.permute.xlu1 %645 }
 0x2f6   :  { %v701_v40 = vrot.slane %v646_v20, %v1546_v56  ;;  %v752_v20 = vsel %vm508_vm2, %v697_v49, %v688_v24 }
 0x2f9   :  { %v649_v48 = vpop.permute.xlu1 %648 }
 0x2fa   :  { %v705_v34 = vrot.slane %v649_v48, %v1543_v55  ;;  %v676_v48 = vpop.permute.xlu0 %675 }
 0x2fb   :  { %v746_v10 = vrot.slane %v676_v48, %v1546_v56 }
 0x2fc   :  { %v706_v53 = vsel %vm443_vm1, %v705_v34, %v701_v40 }
 0x2fd   :  { %v652_v21 = vpop.permute.xlu1 %651  ;;  %v753_v22 = vsel %vm510_vm3, %v706_v53, %v752_v20 }
 0x2fe   :  { %v710_v57 = vrot.slane %v652_v21, %v1546_v56 }
 0x301   :  { %v655_v26 = vpop.permute.xlu1 %654 }
 0x302   :  { %v714_v39 = vrot.slane %v655_v26, %v1543_v55 }
 0x304   :  { %v715_v45 = vsel %vm443_vm1, %v714_v39, %v710_v57 }
 0x305   :  { %v658_v27 = vpop.permute.xlu1 %657 }
 0x306   :  { %v719_v0 = vrot.slane %v658_v27, %v1546_v56  ;;  %v754_v27 = vsel %vm512_vm4, %v715_v45, %v753_v22 }
 0x309   :  { %v661_v29 = vpop.permute.xlu1 %660 }
 0x30a   :  { %v723_v42 = vrot.slane %v661_v29, %v1543_v55 }
 0x30c   :  { %v724_v21 = vsel %vm443_vm1, %v723_v42, %v719_v0 }
 0x30d   :  { %v667_v35 = vpop.permute.xlu1 %666  ;;  %v755_v34 = vsel %vm514_vm5, %v724_v21, %v754_v27  ;;  %v973_v21 = vunpack.c.l.bf16 %v1463_v6 }
 0x30e   :  { %v732_v61 = vrot.slane %v667_v35, %v1543_v55 }
 0x310   :  { %v733_v26 = vsel %vm443_vm1, %v732_v61, %v728_v15 }
 0x311   :  { %v673_v14 = vpop.permute.xlu1 %672  ;;  %v756_v35 = vsel %vm516_vm6, %v733_v26, %v755_v34 }
 0x312   :  { %v741_v17 = vrot.slane %v673_v14, %v1543_v55 }
 0x314   :  { %v742_v29 = vsel %vm443_vm1, %v741_v17, %v737_v19 }
 0x315   :  { %v679_v28 = vpop.permute.xlu1 %678  ;;  %v757_v36 = vsel %vm518_vm7, %v742_v29, %v756_v35 }
 0x316   :  { %v750_v31 = vrot.slane %v679_v28, %v1543_v55 }
 0x318   :  { %v751_v32 = vsel %vm443_vm1, %v750_v31, %v746_v10 }
 0x319   :  { %v758_v37 = vsel %vm520_vm8, %v751_v32, %v757_v36 }
 0x31a   :  { %v760_v39 = vsel %vm523_vm9, %v758_v37, 0.0 }
 0x31b   :  { %761 = vadd.xlane.f32.xlu0 %v760_v39 }
 0x3a8   :  { %v762_v40 = vpop.xlane.xlu0 %761 }
 0x3a9   :  { %1259 = vrcp.f32 %v762_v40 }
 0x3b3   :  { %v1260_v42 = vpop.eup %1259 }
 0x3b4   :  { %v764_v49 = vmul.f32 %v1260_v42, %v762_v40 }
 0x3b6   :  { %v765_v57 = vsub.f32 2.0, %v764_v49 }
 0x3b8   :  { %v766_v61 = vmul.f32 %v1260_v42, %v765_v57  ;;  %v976_v57 = vunpack.c.h.bf16 %v1477_v8 }
 0x3ba   :  { %v787_v53 = vrot.slane %v766_v61, %v546_v23  ;;  %v771_v0 = vrot.slane %v766_v61, %v530_v43  ;;  %v799_v15 = vrot.slane %v766_v61, %v558_v54  ;;  %v775_v19 = vrot.slane %v766_v61, %v534_v46 }
 0x3bc   :  { %v816_v14 = vmul.f32 %v1689_v12, %v787_v53  ;;  %v808_v24 = vmul.f32 %v1643_v44, %v771_v0  ;;  %v822_v45 = vmul.f32 %v1675_v50, %v799_v15  ;;  %v809_v17 = vmul.f32 %v1646_v30, %v771_v0 }
 0x3bd   :  { %v810_v43 = vmul.f32 %v1652_v11, %v775_v19  ;;  %v811_v23 = vmul.f32 %v1658_v38, %v775_v19  ;;  %v779_v44 = vrot.slane %v766_v61, %v538_v63  ;;  %v783_v30 = vrot.slane %v766_v61, %v542_v18 }
 0x3be   :  { %865 = vperm.xlu0 %1208, %v816_v14   ;;  %841 = vperm.xlu1 %1207, %v808_v24   ;;  %v817_v38 = vmul.f32 %v1692_v16, %v787_v53  ;;  %v791_v63 = vrot.slane %v766_v61, %v550_v60  ;;  %v795_v18 = vrot.slane %v766_v61, %v554_v1  ;;  %v971_v1 = vunpack.c.l.bf16 %v1459_v4 }
 0x3bf   :  { %v812_v54 = vmul.f32 %v1665_v41, %v779_v44  ;;  %v813_v50 = vmul.f32 %v1672_v51, %v779_v44  ;;  %v814_v46 = vmul.f32 %v1680_v62, %v783_v30  ;;  %v815_v11 = vmul.f32 %v1685_v13, %v783_v30 }
 0x3c0   :  { %v818_v41 = vmul.f32 %v1661_v58, %v791_v63  ;;  %v819_v51 = vmul.f32 %v1695_v25, %v791_v63  ;;  %v820_v62 = vmul.f32 %v1668_v59, %v795_v18  ;;  %v821_v13 = vmul.f32 %v1698_v47, %v795_v18 }
 0x3c1   :  { %v823_v12 = vmul.f32 %v1701_v33, %v799_v15  ;;  %v972_v25 = vunpack.c.h.bf16 %v1459_v4  ;;  %v969_v59 = vunpack.c.l.bf16 %v1455_v2  ;;  %v974_v4 = vunpack.c.h.bf16 %v1463_v6 }
 0x3c2   :  { %883 = vperm.xlu0 %1208, %v822_v45   ;;  %844 = vperm.xlu1 %1207, %v809_v17   ;;  %v975_v6 = vunpack.c.l.bf16 %v1477_v8  ;;  %v977_v53 = vunpack.c.l.bf16 %v1457_v3  ;;  %v978_v17 = vunpack.c.h.bf16 %v1457_v3  ;;  %v979_v18 = vunpack.c.l.bf16 %v1461_v5 }
 0x3c6   :  { %847 = vperm.xlu1 %1207, %v810_v43  }
 0x3ca   :  { %850 = vperm.xlu1 %1207, %v811_v23  }
 0x3ce   :  { %853 = vperm.xlu1 %1207, %v812_v54  }
 0x3d2   :  { %856 = vperm.xlu1 %1207, %v813_v50  }
 0x3d6   :  { %859 = vperm.xlu1 %1207, %v814_v46  }
 0x3da   :  { %862 = vperm.xlu1 %1207, %v815_v11  }
 0x3de   :  { %868 = vperm.xlu1 %1207, %v817_v38  }
 0x3e2   :  { %871 = vperm.xlu1 %1207, %v818_v41  }
 0x3e6   :  { %874 = vperm.xlu1 %1207, %v819_v51  }
 0x3ea   :  { %877 = vperm.xlu1 %1207, %v820_v62  }
 0x3ee   :  { %880 = vperm.xlu1 %1207, %v821_v13  }
 0x3f2   :  { %886 = vperm.xlu1 %1207, %v823_v12  }
 0x43d   :  { %v1768_v60 = vpop.permute.xlu1 %841  ;;  %v1804_v24 = vpop.permute.xlu0 %865 }
 0x43e   :  { %v1001_v22 = vmul.f32 %v969_v59, %v1768_v60  ;;  %v1009_v23 = vmul.f32 %v977_v53, %v1804_v24  ;;  %v980_v59 = vunpack.c.h.bf16 %v1461_v5  ;;  %v891_v5 = vrot.slane %v1768_v60, %v1546_v56 }
 0x440   :  { %v1017_v34 = vsel %vm135_vm0, %v1001_v22, 0.0  ;;  %v1053_v3 = vsel %vm135_vm0, %v1009_v23, 0.0 }
 0x441   :  { %v1770_v16 = vpop.permute.xlu1 %844 }
 0x442   :  { %v1002_v33 = vmul.f32 %v970_v52, %v1770_v16  ;;  %v983_v52 = vunpack.c.l.bf16 %v1481_v9 }
 0x444   :  { %v1018_v2 = vsel %vm135_vm0, %v1002_v33, 0.0  ;;  %v1824_v33 = vpop.permute.xlu0 %883 }
 0x445   :  { %v1772_v58 = vpop.permute.xlu1 %847  ;;  %v1019_v35 = vadd.f32 %v1018_v2, %v1017_v34 }
 0x446   :  { %v1003_v48 = vmul.f32 %v971_v1, %v1772_v58 }
 0x447   :  { %v1020_v49 = vrot.slane %v1019_v35, 4 }
 0x448   :  { %v1026_v29 = vsel %vm135_vm0, %v1003_v48, 0.0  ;;  %v895_v48 = vrot.slane %v1770_v16, %v1543_v55  ;;  %v1015_v16 = vmul.f32 %v983_v52, %v1824_v33 }
 0x449   :  { %v1778_v20 = vpop.permute.xlu1 %850  ;;  %v1021_v19 = vadd.f32 %v1020_v49, %v1019_v35 }
 0x44a   :  { %v1004_v47 = vmul.f32 %v972_v25, %v1778_v20 }
 0x44b   :  { %v1022_v11 = vrot.slane %v1021_v19, 2 }
 0x44c   :  { %v1027_v26 = vsel %vm135_vm0, %v1004_v47, 0.0  ;;  %v981_v47 = vunpack.c.l.bf16 %v1465_v7 }
 0x44d   :  { %v1786_v27 = vpop.permute.xlu1 %853  ;;  %v1028_v28 = vadd.f32 %v1027_v26, %v1026_v29  ;;  %v1023_v1 = vadd.f32 %v1022_v11, %v1021_v19  ;;  %v982_v26 = vunpack.c.h.bf16 %v1465_v7  ;;  %v904_v7 = vrot.slane %v1778_v20, %v1543_v55 }
 0x44e   :  { %v1005_v10 = vmul.f32 %v973_v21, %v1786_v27 }
 0x44f   :  { %v1029_v36 = vrot.slane %v1028_v28, 4 }
 0x450   :  { %v1035_v37 = vsel %vm135_vm0, %v1005_v10, 0.0 }
 0x451   :  { %v1793_v31 = vpop.permute.xlu1 %856  ;;  %v1030_v0 = vadd.f32 %v1029_v36, %v1028_v28  ;;  %v984_v28 = vunpack.c.h.bf16 %v1481_v9  ;;  %v1024_v36 = vrot.slane %v1023_v1, 1 }
 0x452   :  { %v1006_v32 = vmul.f32 %v974_v4, %v1793_v31  ;;  %v927_v4 = vrot.slane %v1804_v24, %v1546_v56  ;;  %v913_v60 = vrot.slane %v1793_v31, %v1543_v55 }
 0x453   :  { %v1031_v44 = vrot.slane %v1030_v0, 2 }
 0x454   :  { %v1036_v39 = vsel %vm135_vm0, %v1006_v32, 0.0 }
 0x455   :  { %v1037_v40 = vadd.f32 %v1036_v39, %v1035_v37  ;;  %v1799_v42 = vpop.permute.xlu1 %859  ;;  %v1032_v41 = vadd.f32 %v1031_v44, %v1030_v0  ;;  %v896_v39 = vsel %vm443_vm1, %v895_v48, %v891_v5 }
 0x456   :  { %v1007_v14 = vmul.f32 %v975_v6, %v1799_v42  ;;  %v900_v6 = vrot.slane %v1772_v58, %v1546_v56  ;;  %v918_v31 = vrot.slane %v1799_v42, %v1546_v56 }
 0x457   :  { %v1038_v61 = vrot.slane %v1037_v40, 4  ;;  %v1033_v2 = vrot.slane %v1032_v41, 1 }
 0x458   :  { %v1044_v8 = vsel %vm135_vm0, %v1007_v14, 0.0  ;;  %v905_v58 = vsel %vm443_vm1, %v904_v7, %v900_v6 }
 0x459   :  { %v1039_v15 = vadd.f32 %v1038_v61, %v1037_v40  ;;  %v1806_v45 = vpop.permute.xlu1 %862  ;;  %v1034_v49 = vadd.f32 %v1033_v2, %v1032_v41 }
 0x45a   :  { %v1008_v43 = vmul.f32 %v976_v57, %v1806_v45  ;;  %v922_v20 = vrot.slane %v1806_v45, %v1543_v55 }
 0x45b   :  { %v1040_v50 = vrot.slane %v1039_v15, 2 }
 0x45c   :  { %v1045_v54 = vsel %vm135_vm0, %v1008_v43, 0.0 }
 0x45d   :  { %v1046_v30 = vadd.f32 %v1045_v54, %v1044_v8  ;;  %v1813_v46 = vpop.permute.xlu1 %868  ;;  %v1041_v62 = vadd.f32 %v1040_v50, %v1039_v15  ;;  %v1025_v15 = vadd.f32 %v1024_v36, %v1023_v1 }
 0x45e   :  { %v1010_v38 = vmul.f32 %v978_v17, %v1813_v46  ;;  %v909_v17 = vrot.slane %v1786_v27, %v1546_v56  ;;  %v931_v43 = vrot.slane %v1813_v46, %v1543_v55 }
 0x45f   :  { %v1047_v63 = vrot.slane %v1046_v30, 4  ;;  %v1042_v10 = vrot.slane %v1041_v62, 1  ;;  %v1097_v45 = vsel %vm508_vm2, %v1034_v49, %v1025_v15 }
 0x460   :  { %v1054_v51 = vsel %vm135_vm0, %v1010_v38, 0.0  ;;  %v914_v8 = vsel %vm443_vm1, %v913_v60, %v909_v17 }
 0x461   :  { %v1048_v13 = vadd.f32 %v1047_v63, %v1046_v30  ;;  %v1055_v12 = vadd.f32 %v1054_v51, %v1053_v3  ;;  %v1819_v25 = vpop.permute.xlu1 %871  ;;  %v1043_v53 = vadd.f32 %v1042_v10, %v1041_v62  ;;  %v923_v30 = vsel %vm443_vm1, %v922_v20, %v918_v31 }
 0x462   :  { %v1011_v29 = vmul.f32 %v979_v18, %v1819_v25  ;;  %v936_v42 = vrot.slane %v1819_v25, %v1546_v56  ;;  %v960_v51 = vsel %vm508_vm2, %v905_v58, %v896_v39  ;;  %v932_v18 = vsel %vm443_vm1, %v931_v43, %v927_v4 }
 0x463   :  { %v1049_v21 = vrot.slane %v1048_v13, 2  ;;  %v1056_v22 = vrot.slane %v1055_v12, 4  ;;  %v1098_v63 = vsel %vm510_vm3, %v1043_v53, %v1097_v45 }
 0x464   :  { %v1062_v57 = vsel %vm135_vm0, %v1011_v29, 0.0 }
 0x465   :  { %v1050_v34 = vadd.f32 %v1049_v21, %v1048_v13  ;;  %v1057_v35 = vadd.f32 %v1056_v22, %v1055_v12  ;;  %v875_v32 = vpop.permute.xlu1 %874  ;;  %v961_v12 = vsel %vm510_vm3, %v914_v8, %v960_v51 }
 0x466   :  { %v1012_v37 = vmul.f32 %v980_v59, %v875_v32  ;;  %v940_v54 = vrot.slane %v875_v32, %v1543_v55  ;;  %v962_v59 = vsel %vm512_vm4, %v923_v30, %v961_v12 }
 0x467   :  { %v1051_v9 = vrot.slane %v1050_v34, 1  ;;  %v1058_v40 = vrot.slane %v1057_v35, 2  ;;  %v963_v4 = vsel %vm514_vm5, %v932_v18, %v962_v59 }
 0x468   :  { %v1063_v61 = vsel %vm135_vm0, %v1012_v37, 0.0  ;;  %v941_v52 = vsel %vm443_vm1, %v940_v54, %v936_v42 }
 0x469   :  { %v1059_v0 = vadd.f32 %v1058_v40, %v1057_v35  ;;  %v1064_v14 = vadd.f32 %v1063_v61, %v1062_v57  ;;  %v878_v24 = vpop.permute.xlu1 %877  ;;  %v1052_v19 = vadd.f32 %v1051_v9, %v1050_v34  ;;  %v964_v10 = vsel %vm516_vm6, %v941_v52, %v963_v4 }
 0x46a   :  { %v1013_v50 = vmul.f32 %v981_v47, %v878_v24  ;;  %v945_v62 = vrot.slane %v878_v24, %v1546_v56  ;;  %v1080_v34 = vsel %vm135_vm0, %v1015_v16, 0.0 }
 0x46b   :  { %v1060_v23 = vrot.slane %v1059_v0, 1  ;;  %v1065_v44 = vrot.slane %v1064_v14, 4  ;;  %v1099_v41 = vsel %vm512_vm4, %v1052_v19, %v1098_v63 }
 0x46c   :  { %v1071_v1 = vsel %vm135_vm0, %v1013_v50, 0.0 }
 0x46d   :  { %v1061_v11 = vadd.f32 %v1060_v23, %v1059_v0  ;;  %v1066_v27 = vadd.f32 %v1065_v44, %v1064_v14  ;;  %v881_v38 = vpop.permute.xlu1 %880 }
 0x46e   :  { %v949_v46 = vrot.slane %v881_v38, %v1543_v55  ;;  %v1014_v3 = vmul.f32 %v982_v26, %v881_v38  ;;  %v954_v26 = vrot.slane %v1824_v33, %v1546_v56 }
 0x46f   :  { %v1100_v13 = vsel %vm514_vm5, %v1061_v11, %v1099_v41  ;;  %v1067_v47 = vrot.slane %v1066_v27, 2 }
 0x470   :  { %v1072_v25 = vsel %vm135_vm0, %v1014_v3, 0.0  ;;  %v950_v48 = vsel %vm443_vm1, %v949_v46, %v945_v62 }
 0x471   :  { %v1073_v21 = vadd.f32 %v1072_v25, %v1071_v1  ;;  %v887_v22 = vpop.permute.xlu1 %886  ;;  %v965_v36 = vsel %vm518_vm7, %v950_v48, %v964_v10  ;;  %v1068_v7 = vadd.f32 %v1067_v47, %v1066_v27 }
 0x472   :  { %v958_v2 = vrot.slane %v887_v22, %v1543_v55  ;;  %v1016_v29 = vmul.f32 %v984_v28, %v887_v22 }
 0x473   :  { %v1074_v5 = vrot.slane %v1073_v21, 4 }
 0x474   :  { %v959_v35 = vsel %vm443_vm1, %v958_v2, %v954_v26  ;;  %v1081_v32 = vsel %vm135_vm0, %v1016_v29, 0.0 }
 0x475   :  { %v1075_v37 = vadd.f32 %v1074_v5, %v1073_v21  ;;  %v1082_v56 = vadd.f32 %v1081_v32, %v1080_v34  ;;  %v966_v33 = vsel %vm520_vm8, %v959_v35, %v965_v36 }
 0x476   :  { %968 = vst.msk [vmem:[#allocation9] sm:$0xff] %vm523_vm9, %v966_v33 }
 0x477   :  { %v1076_v55 = vrot.slane %v1075_v37, 2  ;;  %v1083_v28 = vrot.slane %v1082_v56, 4 }
 0x478   :  { %1338 = shalt.err (!%p1335_p0)
}
 0x479   :  { %s1339_s11 = scalar_lea.hbm %s1917_s5, 128 }
 0x47a   :  { %p1340_p1 = scmp.ne.s32.totalorder %s1917_s5, %s1339_s11  ;;  %p1343_p2 = scmp.lt.u32.totalorder %s1339_s11, %s1917_s5 }
 0x47c   :  { %p1345_p3 = pnand %p1343_p2, %p1340_p1 }
 0x47e   :  { %1348 = shalt.err (!%p1345_p3)
}
 0x47f   :  { %1125 = dma.vmem_to_hbm [thread:$0]  %s1123_s7, 128, %s1917_s5, [#allocation10]   ;;  %v1069_v16 = vrot.slane %v1068_v7, 1  ;;  %v1077_v39 = vadd.f32 %v1076_v55, %v1075_v37  ;;  %v1084_v6 = vadd.f32 %v1083_v28, %v1082_v56 }
 0x480   :  { %s1388_s17 = smov [#allocation8]  }
 0x481   :  { %v1078_v9 = vrot.slane %v1077_v39, 1  ;;  %v1085_v40 = vrot.slane %v1084_v6, 2  ;;  %v1070_v49 = vadd.f32 %v1069_v16, %v1068_v7  ;;  %s1112_s18 = sshll.u32 %s1388_s17, 4  ;;  %s1113_s18 = int_to_ptr.vmem [resolvable:$true] %s1112_s18 }
 0x482   :  { %s1349_s5 = scalar_lea.vmem %s1113_s18, 128  ;;  %p1354_p5 = scmp.lt.s32.totalorder %s1113_s18, %s1113_s18 }
 0x483   :  { %v1086_v60 = vadd.f32 %v1085_v40, %v1084_v6  ;;  %v1079_v57 = vadd.f32 %v1078_v9, %v1077_v39  ;;  %v1101_v20 = vsel %vm516_vm6, %v1070_v49, %v1100_v13  ;;  %p1350_p4 = scmp.ne.s32.totalorder %s1113_s18, %s1349_s5  ;;  %p1355_p6 = scmp.lt.s32.totalorder %s1349_s5, %s1349_s5 }
 0x485   :  { %v1087_v61 = vrot.slane %v1086_v60, 1  ;;  %v1102_v0 = vsel %vm518_vm7, %v1079_v57, %v1101_v20  ;;  %p1356_p7 = por %p1355_p6, %p1354_p5 }
 0x487   :  { %v1088_v53 = vadd.f32 %v1087_v61, %v1086_v60  ;;  %p1357_p8 = pnand %p1356_p7, %p1350_p4 }
 0x489   :  { %v1103_v14 = vsel %vm520_vm8, %v1088_v53, %v1102_v0 }
 0x48a   :  { %1105 = vst.msk [vmem:[#allocation8] sm:$0xff] %vm135_vm0, %v1103_v14 }
 0x48b   :  { %1360 = shalt.err (!%p1357_p8)
}
 0x48c   :  { %s1361_s21 = scalar_lea.hbm %s1916_s4, 128 }
 0x48d   :  { %p1362_p9 = scmp.ne.s32.totalorder %s1916_s4, %s1361_s21  ;;  %p1365_p10 = scmp.lt.u32.totalorder %s1361_s21, %s1916_s4 }
 0x48f   :  { %p1367_p11 = pnand %p1365_p10, %p1362_p9 }
 0x491   :  { %1370 = shalt.err (!%p1367_p11)
}
 0x492   :  { %1115 = dma.vmem_to_hbm [thread:$0]  %s1113_s18, 128, %s1916_s4, [#allocation4]  }
 0x493   :  { %1375 = dma.done.wait [#allocation4], 128  }
 0x494   :  { %1376 = vsyncadd [#allocation4], 4294967168 }
 0x495   :  { %1377 = dma.done.wait [#allocation10], 128  }
 0x496   :  { %1378 = vsyncadd [#allocation10], 4294967168 }
 0x497   :  { %1132 = vsyncpa [#allocation3], 1 }
 0x498   :  { %1133 = vsyncpa [#allocation6], 1 }
 0x499   :  { %1134 = vsyncpa [#allocation4], 1 }
 0x49a   :  { %1135 = vsyncpa [#allocation10], 1 }

</bundles_post_ra>
